<compile_context>
chip_gen: v7x
topology: tpu7x:2x2x1
jax: 0.10.0
libtpu: 0.0.40
codegen_flags: <defaults>
</compile_context>

<pallas_src>
import math

import jax
import jax.numpy as jnp
from jax import lax
from jax.experimental import pallas as pl
from jax.experimental.pallas import tpu as pltpu

OMEGA = 14.0
THETA = 0.5
EPSILON = 1.0
ALPHA = 2.1

_MAX_TM = 256                 # max rows per block -> 0.5 MiB f32 per input block
_COL_CHOICES = (512, 256, 128)  # lane-dense last dims (multiples of 128)


def _round_up(x, m):
    return ((x + m - 1) // m) * m


def _sublane_multiple(*dtypes):
    """Row multiple required by the (sublane, 128) tile of the narrowest dtype."""
    m = 8
    for dt in dtypes:
        itemsize = jnp.dtype(dt).itemsize
        m = max(m, 8 * max(1, 4 // itemsize))
    return m


def _num_core_slices():
    """2 when a single Pallas device owns two TensorCores (v4/v5p megacore, v7x)."""
    try:
        kind = jax.devices()[0].device_kind.lower()
    except Exception:
        return 1
    if ("v4" in kind) or ("v5p" in kind) or ("v7" in kind):
        return 2
    return 1


def _make_awing_kernel(tm, cols, steps, n_valid, need_mask):
    """Builds the per-block kernel; all tiling parameters are Python constants."""
    log_t = math.log(THETA / EPSILON)   # ln(theta/eps)
    a_scale = OMEGA / THETA             # omega * t^(a-y-1) * (1/eps) == (omega/theta) * t^(a-y)
    inv_omega = 1.0 / OMEGA
    blk_elems = tm * cols
    tail_blk = max((n_valid - 1) // blk_elems, 0)

    def fold(x):
        # (tm, cols) -> (8, cols) accumulator fold: pure vreg adds, no XLU reduce.
        return x.reshape(tm // 8, 8, cols).sum(axis=0)

    def kernel(pred_ref, target_ref, out_ref):
        p_id = pl.program_id(0)
        s_id = pl.program_id(1)

        # Zero this core-slice's resident accumulator block once.
        @pl.when(s_id == 0)
        def _():
            out_ref[...] = jnp.zeros_like(out_ref)

        pred = pred_ref[...].astype(jnp.float32)
        y = target_ref[...].astype(jnp.float32)

        # Sigmoid via a single EUP tanh (this kernel's binding slot is the EUP).
        y_hat = 0.5 * jnp.tanh(pred * 0.5) + 0.5
        delta = jnp.abs(y - y_hat)
        a_minus_y = ALPHA - y

        # Branch 1 (delta < theta):
        #   omega * log(1 + (delta/omega)^(alpha-y)), power written as the minimal
        #   exp/log pair.  delta == 0 -> log=-inf -> exp=0, matching pow(0, a-y>0)=0.
        pw = jnp.exp(a_minus_y * jnp.log(delta * inv_omega))
        loss1 = OMEGA * jnp.log(1.0 + pw)

        # Branch 2 (delta >= theta), with t = theta/eps a compile-time constant:
        #   p = t^(alpha-y) = exp((alpha-y) * ln t)
        #   A = (omega/theta) * p * (alpha-y) / (1 + p)
        #   C = theta*A - omega*log(1 + p)
        pt = jnp.exp(a_minus_y * log_t)
        one_plus = 1.0 + pt
        r = pl.reciprocal(one_plus, approx=True)
        r = r * (2.0 - one_plus * r)        # one Newton step: rel err ~1e-7
        A = a_scale * pt * a_minus_y * r
        C = THETA * A - OMEGA * jnp.log(one_plus)
        loss2 = A * delta - C

        loss = jnp.where(delta < THETA, loss1, loss2)

        if need_mask:
            blk = p_id * steps + s_id       # logical row-block index

            @pl.when(blk < tail_blk)
            def _():
                out_ref[...] += fold(loss)

            @pl.when(blk >= tail_blk)
            def _():
                # Only the tail block(s) pay for the mask iotas.  `remaining` <= 0
                # for fully-padded / out-of-range blocks, zeroing them entirely
                # (so Pallas' clamped/indeterminate boundary reads never leak in).
                remaining = jnp.int32(n_valid) - blk * jnp.int32(blk_elems)
                flat = (lax.broadcasted_iota(jnp.int32, (tm, cols), 0) * cols
                        + lax.broadcasted_iota(jnp.int32, (tm, cols), 1))
                out_ref[...] += fold(jnp.where(flat < remaining, loss, 0.0))
        else:
            out_ref[...] += fold(loss)

    return kernel


def adaptive_wing_loss(pred, target, reduction="mean"):
    """pred, target: same-shape float arrays (e.g. B,N,H,W). Scalar 'mean'/'sum'."""
    assert pred.shape == target.shape
    n = math.prod(pred.shape)
    assert 0 < n < 2**31, "flat-index tail mask uses int32"

    row_mult = _sublane_multiple(pred.dtype, target.dtype)

    # Pick a lane-dense column count.  Prefer one giving an exact row tiling (no
    # mask); otherwise any divisor of n (whole-row tail handled in-kernel).  The
    # jnp.pad fallback (one extra HBM pass) only triggers when n % 128 != 0 or
    # the input is tiny.
    cols = None
    for c in _COL_CHOICES:
        if n % c == 0 and (n // c) % row_mult == 0:
            cols = c
            break
    if cols is None:
        for c in _COL_CHOICES:
            if n % c == 0:
                cols = c
                break
    if cols is None:
        cols = 128

    rows = pl.cdiv(n, cols)
    rows_arr = max(rows, row_mult)          # keep at least one (row_mult, cols) tile
    padded_n = rows_arr * cols

    flat_p = pred.reshape(-1)
    flat_t = target.reshape(-1)
    if padded_n != n:
        # TODO(synk): rare path (n not a multiple of 128, or tiny input); costs one
        # extra HBM pass over the inputs.
        flat_p = jnp.pad(flat_p, (0, padded_n - n))
        flat_t = jnp.pad(flat_t, (0, padded_n - n))
    pred2d = flat_p.reshape(rows_arr, cols)
    target2d = flat_t.reshape(rows_arr, cols)

    # Core split: 2 only when the device has two TensorCores and there is at
    # least one full tile per core; otherwise a size-2 "parallel" axis would
    # just serialize and waste padded compute.
    P = _num_core_slices()
    if rows_arr < P * row_mult:
        P = 1

    num_blocks = P * max(1, pl.cdiv(rows_arr, _MAX_TM * P))
    tm = min(_MAX_TM, _round_up(pl.cdiv(rows_arr, num_blocks), row_mult))
    steps = pl.cdiv(pl.cdiv(rows_arr, tm), P)
    total_blocks = P * steps
    need_mask = (total_blocks * tm * cols) != n

    kernel = _make_awing_kernel(tm, cols, steps, n, need_mask)

    def in_index_map(p, s):
        return (p * steps + s, 0)

    def out_index_map(p, s):
        return (p, 0)

    cost = pl.CostEstimate(
        flops=25 * n,
        transcendentals=7 * n,
        bytes_accessed=n * (pred.dtype.itemsize + target.dtype.itemsize)
        + P * 8 * cols * 4,
    )

    partials = pl.pallas_call(
        kernel,
        out_shape=jax.ShapeDtypeStruct((P * 8, cols), jnp.float32),
        grid_spec=pltpu.PrefetchScalarGridSpec(
            num_scalar_prefetch=0,
            grid=(P, steps),
            in_specs=[
                pl.BlockSpec((tm, cols), in_index_map),
                pl.BlockSpec((tm, cols), in_index_map),
            ],
            out_specs=pl.BlockSpec((8, cols), out_index_map),
        ),
        compiler_params=pltpu.CompilerParams(
            dimension_semantics=("parallel", "arbitrary"),
        ),
        cost_estimate=cost,
    )(pred2d, target2d)

    total = jnp.sum(partials)
    if reduction == "mean":
        return total / jnp.float32(n)
    if reduction == "sum":
        return total
    if reduction == "none":
        # TODO(synk): torch's 'none' returns per-element losses in boolean-mask
        # concatenation order (all loss1 then all loss2); not reproduced here.
        raise NotImplementedError("reduction='none' is not supported by this kernel")
    raise ValueError(f"Invalid reduction mode: {reduction}")


def _reference(pred, target):
    """Pure-JAX reference matching the PyTorch AdaptiveWingLoss forward (mean)."""
    y = target.astype(jnp.float32)
    y_hat = jax.nn.sigmoid(pred.astype(jnp.float32))
    delta = jnp.abs(y - y_hat)
    t = THETA / EPSILON
    loss1 = OMEGA * jnp.log(1.0 + jnp.power(delta / OMEGA, ALPHA - y))
    A = (OMEGA * (1.0 / (1.0 + jnp.power(t, ALPHA - y))) * (ALPHA - y)
         * jnp.power(t, ALPHA - y - 1.0) * (1.0 / EPSILON))
    C = THETA * A - OMEGA * jnp.log(1.0 + jnp.power(t, ALPHA - y))
    loss2 = A * delta - C
    return jnp.mean(jnp.where(delta < THETA, loss1, loss2))


if __name__ == "__main__":
    key = jax.random.PRNGKey(0)
    k1, k2 = jax.random.split(key)
    B, N, H, W = 2, 4, 16, 16
    pred = jax.random.normal(k1, (B, N, H, W), dtype=jnp.float32) * 2.0
    target = jax.nn.sigmoid(jax.random.normal(k2, (B, N, H, W), dtype=jnp.float32))

    # Deterministically exercise both loss branches, incl. the delta == 0 corner.
    pred = pred.at[0, 0, 0, 0].set(40.0)
    target = target.at[0, 0, 0, 0].set(1.0)    # y_hat == 1 -> delta == 0 (branch 1)
    pred = pred.at[0, 0, 0, 1].set(-40.0)
    target = target.at[0, 0, 0, 1].set(1.0)    # delta == 1 >= theta (branch 2)

    out = adaptive_wing_loss(pred, target, reduction="mean")
    out = jax.block_until_ready(out)

    ref = _reference(pred, target)
    assert jnp.allclose(out, ref, rtol=1e-4, atol=1e-4), (out, ref)
    print("KERNEL_OK")
</pallas_src>

<mosaic_0001>
module attributes {stable_mosaic.version = 11 : i64} {
  func.func @kernel(%arg0: i32, %arg1: i32, %arg2: memref<8x256xf32, #tpu.memory_space<vmem>>, %arg3: memref<8x256xf32, #tpu.memory_space<vmem>>, %arg4: memref<8x256xf32, #tpu.memory_space<vmem>>) attributes {dimension_semantics = [#tpu.dimension_semantics<parallel>, #tpu.dimension_semantics<arbitrary>], iteration_bounds = array<i64: 1, 1>, scalar_prefetch = 0 : i64, scratch_operands = 0 : i64, tpu.core_type = #tpu.core_type<tc>, window_params = [{transform_indices = @transform_0, window_bounds = array<i64: 8, 256>}, {transform_indices = @transform_1, window_bounds = array<i64: 8, 256>}, {transform_indices = @transform_2, window_bounds = array<i64: 8, 256>}]} {
    %c0_i32 = arith.constant 0 : i32
    %0 = arith.cmpi eq, %arg1, %c0_i32 : i32
    %1 = arith.extui %0 : i1 to i32
    %c0_i32_0 = arith.constant 0 : i32
    %2 = arith.cmpi ne, %1, %c0_i32_0 : i32
    scf.if %2 {
      %cst_22 = arith.constant 0.000000e+00 : f32
      %56 = vector.broadcast %cst_22 : f32 to vector<8x256xf32>
      %c0_23 = arith.constant 0 : index
      %c0_24 = arith.constant 0 : index
      %57 = vector.load %arg4[%c0_23, %c0_24] : memref<8x256xf32, #tpu.memory_space<vmem>>, vector<8x256xf32>
      tpu.vector_store %arg4[%c0_23, %c0_24], %56 {strides = array<i32>} : memref<8x256xf32, #tpu.memory_space<vmem>>, vector<8x256xf32>,
    } else {
    }
    %c0 = arith.constant 0 : index
    %c0_1 = arith.constant 0 : index
    %3 = vector.load %arg2[%c0, %c0_1] : memref<8x256xf32, #tpu.memory_space<vmem>>, vector<8x256xf32>
    %c0_2 = arith.constant 0 : index
    %c0_3 = arith.constant 0 : index
    %4 = vector.load %arg3[%c0_2, %c0_3] : memref<8x256xf32, #tpu.memory_space<vmem>>, vector<8x256xf32>
    %cst = arith.constant 5.000000e-01 : f32
    %5 = vector.broadcast %cst : f32 to vector<8x256xf32>
    %6 = arith.mulf %3, %5 : vector<8x256xf32>
    %7 = math.tanh %6 : vector<8x256xf32>
    %cst_4 = arith.constant 5.000000e-01 : f32
    %8 = vector.broadcast %cst_4 : f32 to vector<8x256xf32>
    %9 = arith.mulf %8, %7 : vector<8x256xf32>
    %cst_5 = arith.constant 5.000000e-01 : f32
    %10 = vector.broadcast %cst_5 : f32 to vector<8x256xf32>
    %11 = arith.addf %9, %10 : vector<8x256xf32>
    %12 = arith.subf %4, %11 : vector<8x256xf32>
    %13 = math.absf %12 : vector<8x256xf32>
    %cst_6 = arith.constant 2.100000e+00 : f32
    %14 = vector.broadcast %cst_6 : f32 to vector<8x256xf32>
    %15 = arith.subf %14, %4 : vector<8x256xf32>
    %cst_7 = arith.constant 0.0714285746 : f32
    %16 = vector.broadcast %cst_7 : f32 to vector<8x256xf32>
    %17 = arith.mulf %13, %16 : vector<8x256xf32>
    %18 = math.log %17 : vector<8x256xf32>
    %19 = arith.mulf %15, %18 : vector<8x256xf32>
    %20 = math.exp %19 : vector<8x256xf32>
    %cst_8 = arith.constant 1.000000e+00 : f32
    %21 = vector.broadcast %cst_8 : f32 to vector<8x256xf32>
    %22 = arith.addf %21, %20 : vector<8x256xf32>
    %23 = math.log %22 : vector<8x256xf32>
    %cst_9 = arith.constant 1.400000e+01 : f32
    %24 = vector.broadcast %cst_9 : f32 to vector<8x256xf32>
    %25 = arith.mulf %24, %23 : vector<8x256xf32>
    %cst_10 = arith.constant -0.693147182 : f32
    %26 = vector.broadcast %cst_10 : f32 to vector<8x256xf32>
    %27 = arith.mulf %15, %26 : vector<8x256xf32>
    %28 = math.exp %27 : vector<8x256xf32>
    %cst_11 = arith.constant 1.000000e+00 : f32
    %29 = vector.broadcast %cst_11 : f32 to vector<8x256xf32>
    %30 = arith.addf %29, %28 : vector<8x256xf32>
    %31 = tpu.reciprocal %30 {approx = true} : vector<8x256xf32> -> vector<8x256xf32>
    %32 = arith.mulf %30, %31 : vector<8x256xf32>
    %cst_12 = arith.constant 2.000000e+00 : f32
    %33 = vector.broadcast %cst_12 : f32 to vector<8x256xf32>
    %34 = arith.subf %33, %32 : vector<8x256xf32>
    %35 = arith.mulf %31, %34 : vector<8x256xf32>
    %cst_13 = arith.constant 2.800000e+01 : f32
    %36 = vector.broadcast %cst_13 : f32 to vector<8x256xf32>
    %37 = arith.mulf %36, %28 : vector<8x256xf32>
    %38 = arith.mulf %37, %15 : vector<8x256xf32>
    %39 = arith.mulf %38, %35 : vector<8x256xf32>
    %cst_14 = arith.constant 5.000000e-01 : f32
    %40 = vector.broadcast %cst_14 : f32 to vector<8x256xf32>
    %41 = arith.mulf %40, %39 : vector<8x256xf32>
    %42 = math.log %30 : vector<8x256xf32>
    %cst_15 = arith.constant 1.400000e+01 : f32
    %43 = vector.broadcast %cst_15 : f32 to vector<8x256xf32>
    %44 = arith.mulf %43, %42 : vector<8x256xf32>
    %45 = arith.subf %41, %44 : vector<8x256xf32>
    %46 = arith.mulf %39, %13 : vector<8x256xf32>
    %47 = arith.subf %46, %45 : vector<8x256xf32>
    %cst_16 = arith.constant 5.000000e-01 : f32
    %48 = vector.broadcast %cst_16 : f32 to vector<8x256xf32>
    %49 = arith.cmpf olt, %13, %48 : vector<8x256xf32>
    %50 = arith.select %49, %25, %47 : vector<8x256xi1>, vector<8x256xf32>
    %c0_17 = arith.constant 0 : index
    %c0_18 = arith.constant 0 : index
    %51 = vector.load %arg4[%c0_17, %c0_18] : memref<8x256xf32, #tpu.memory_space<vmem>>, vector<8x256xf32>
    %52 = vector.shape_cast %50 : vector<8x256xf32> to vector<1x8x256xf32>
    %cst_19 = arith.constant dense<0.000000e+00> : vector<8x256xf32>
    %53 = vector.multi_reduction <add>, %52, %cst_19 [0] : vector<1x8x256xf32> to vector<8x256xf32>
    %54 = arith.addf %51, %53 : vector<8x256xf32>
    %c0_20 = arith.constant 0 : index
    %c0_21 = arith.constant 0 : index
    %55 = vector.load %arg4[%c0_20, %c0_21] : memref<8x256xf32, #tpu.memory_space<vmem>>, vector<8x256xf32>
    tpu.vector_store %arg4[%c0_20, %c0_21], %54 {strides = array<i32>} : memref<8x256xf32, #tpu.memory_space<vmem>>, vector<8x256xf32>,
    return
  }
  func.func @transform_0(%arg0: i32, %arg1: i32) -> (i32, i32) {
    %c1_i32 = arith.constant 1 : i32
    %0 = arith.muli %arg0, %c1_i32 : i32
    %1 = arith.addi %0, %arg1 : i32
    %c0_i32 = arith.constant 0 : i32
    %c0_i32_0 = arith.constant 0 : i32
    return %1, %c0_i32 : i32, i32
  }
  func.func @transform_1(%arg0: i32, %arg1: i32) -> (i32, i32) {
    %c1_i32 = arith.constant 1 : i32
    %0 = arith.muli %arg0, %c1_i32 : i32
    %1 = arith.addi %0, %arg1 : i32
    %c0_i32 = arith.constant 0 : i32
    %c0_i32_0 = arith.constant 0 : i32
    return %1, %c0_i32 : i32, i32
  }
  func.func @transform_2(%arg0: i32, %arg1: i32) -> (i32, i32) {
    %c0_i32 = arith.constant 0 : i32
    %c0_i32_0 = arith.constant 0 : i32
    return %arg0, %c0_i32 : i32, i32
  }
}

</mosaic_0001>

<bundles_post_ra>
// kernel: tpu_custom_call.1
= control target key start
LH: loop header
LB: loop body
LE: loop exit
PB: predicated region body
PF: predicated region fallthrough
CT: control target
= control target key end

     0   :  { %7 = vsyncpa [#allocation3], 0  ;;  %s322_s0 = inlined_call_operand.hbm [shape: f32[8,256], index: 0, kind: input, shape index: {}]   ;;  %s323_s1 = inlined_call_operand.hbm [shape: f32[8,256], index: 1, kind: input, shape index: {}]   ;;  %s324_s2 = inlined_call_operand.hbm [shape: f32[8,256], index: 2, kind: output, shape index: {}]  }
   0x1   :  { %8 = vsyncpa [#allocation6], 0 }
   0x2   :  { %9 = vsyncpa [#allocation4], 0  ;;  %s258_s9 = smov [#allocation2]   ;;  %s259_s11 = smov [#allocation5]  }
   0x3   :  { %s20_s10 = sshll.u32 %s258_s9, 4  ;;  %s34_s12 = sshll.u32 %s259_s11, 4  ;;  %s21_s10 = int_to_ptr.vmem [resolvable:$true] %s20_s10  ;;  %s35_s12 = int_to_ptr.vmem [resolvable:$true] %s34_s12 }
   0x4   :  { %s186_s15 = scalar_lea.hbm %s322_s0, 256 }
   0x5   :  { %p187_p0 = scmp.ne.s32.totalorder %s322_s0, %s186_s15  ;;  %p190_p1 = scmp.lt.u32.totalorder %s186_s15, %s322_s0 }
   0x7   :  { %p192_p2 = pnand %p190_p1, %p187_p0 }
   0x9   :  { %195 = shalt.err (!%p192_p2)
}
   0xa   :  { %s196_s20 = scalar_lea.vmem %s21_s10, 256  ;;  %p201_p4 = scmp.lt.s32.totalorder %s21_s10, %s21_s10 }
   0xb   :  { %p197_p3 = scmp.ne.s32.totalorder %s21_s10, %s196_s20  ;;  %p202_p5 = scmp.lt.s32.totalorder %s196_s20, %s196_s20 }
   0xd   :  { %p203_p6 = por %p202_p5, %p201_p4 }
   0xf   :  { %p204_p7 = pnand %p203_p6, %p197_p3 }
  0x11   :  { %207 = shalt.err (!%p204_p7)
}
  0x12   :  { %23 = dma.hbm_to_vmem [thread:$0]  %s322_s0, 256, %s21_s10, [#allocation3]  }
  0x13   :  { %s208_s25 = scalar_lea.hbm %s323_s1, 256 }
  0x14   :  { %p209_p8 = scmp.ne.s32.totalorder %s323_s1, %s208_s25  ;;  %p212_p9 = scmp.lt.u32.totalorder %s208_s25, %s323_s1 }
  0x16   :  { %p214_p10 = pnand %p212_p9, %p209_p8 }
  0x18   :  { %217 = shalt.err (!%p214_p10)
}
  0x19   :  { %s218_s30 = scalar_lea.vmem %s35_s12, 256  ;;  %p223_p12 = scmp.lt.s32.totalorder %s35_s12, %s35_s12 }
  0x1a   :  { %p219_p11 = scmp.ne.s32.totalorder %s35_s12, %s218_s30  ;;  %p224_p13 = scmp.lt.s32.totalorder %s218_s30, %s218_s30 }
  0x1c   :  { %p225_p0 = por %p224_p13, %p223_p12 }
  0x1e   :  { %p226_p1 = pnand %p225_p0, %p219_p11 }
  0x20   :  { %229 = shalt.err (!%p226_p1)
}
  0x21   :  { %37 = dma.hbm_to_vmem [thread:$0]  %s323_s1, 256, %s35_s12, [#allocation6]  }
  0x22   :  { %252 = dma.done.wait [#allocation3], 256  }
  0x23   :  { %253 = vsyncadd [#allocation3], 4294967040 }
  0x24   :  { %254 = dma.done.wait [#allocation6], 256  }
  0x25   :  { %255 = vsyncadd [#allocation6], 4294967040  ;;  %v52_v0 = vld [vmem:[#allocation2] sm:$0xff]  ;;  %v54_v1 = vld [vmem:[#allocation5] sm:$0xff]  ;;  %s260_s1 = smov [#allocation7]  }
  0x26   :  { %v53_v2 = vld [vmem:[#allocation2 + $0x8] sm:$0xff]  ;;  %v56_v3 = vmul.f32 0.5, %v52_v0  ;;  %v68_v4 = vsub.f32 2.1, %v54_v1  ;;  %v55_v5 = vld [vmem:[#allocation5 + $0x8] sm:$0xff]  ;;  %s144_s4 = sshll.u32 %s260_s1, 4  ;;  %s145_s4 = int_to_ptr.vmem [resolvable:$true] %s144_s4 }
  0x27   :  { %v57_v6 = vmul.f32 0.5, %v53_v2  ;;  %v69_v7 = vsub.f32 2.1, %v55_v5  ;;  %s230_s5 = scalar_lea.vmem %s145_s4, 256  ;;  %p235_p3 = scmp.lt.s32.totalorder %s145_s4, %s145_s4 }
  0x28   :  { %158 = vtanh.f32 %v56_v3  ;;  %v90_v8 = vmul.f32 -0.6931472, %v68_v4  ;;  %p231_p2 = scmp.ne.s32.totalorder %s145_s4, %s230_s5  ;;  %p236_p4 = scmp.lt.s32.totalorder %s230_s5, %s230_s5 }
  0x29   :  { %160 = vtanh.f32 %v57_v6  ;;  %v91_v9 = vmul.f32 -0.6931472, %v69_v7 }
  0x2a   :  { %v92_v10 = vmul.f32 1.442695, %v90_v8  ;;  %p237_p5 = por %p236_p4, %p235_p3 }
  0x2b   :  { %v94_v11 = vmul.f32 1.442695, %v91_v9 }
  0x2c   :  { %162 = vpow2.f32 %v92_v10  ;;  %p238_p6 = pnand %p237_p5, %p231_p2 }
  0x2d   :  { %164 = vpow2.f32 %v94_v11 }
  0x32   :  { %v159_v12 = vpop.eup %158 }
  0x33   :  { %v161_v13 = vpop.eup %160  ;;  %v60_v14 = vmul.f32 0.5, %v159_v12 }
  0x34   :  { %v61_v15 = vmul.f32 0.5, %v161_v13 }
  0x35   :  { %v62_v16 = vadd.f32 0.5, %v60_v14 }
  0x36   :  { %v63_v17 = vadd.f32 0.5, %v61_v15  ;;  %v163_v21 = vpop.eup %162 }
  0x37   :  { %v64_v18 = vsub.f32 %v54_v1, %v62_v16  ;;  %v165_v23 = vpop.eup %164  ;;  %v96_v26 = vadd.f32 1.0, %v163_v21  ;;  %v106_v41 = vmul.f32 28.0, %v163_v21 }
  0x38   :  { %v65_v19 = vsub.f32 %v55_v5, %v63_v17  ;;  %v97_v27 = vadd.f32 1.0, %v165_v23  ;;  %v107_v43 = vmul.f32 28.0, %v165_v23 }
  0x39   :  { %v300_v20 = vand.u32 2147483647, %v64_v18  ;;  %v108_v46 = vmul.f32 %v106_v41, %v68_v4 }
  0x3a   :  { %v302_v22 = vand.u32 2147483647, %v65_v19  ;;  %v109_v49 = vmul.f32 %v107_v43, %v69_v7 }
  0x3b   :  { %v70_v24 = vmul.f32 0.071428575, %v300_v20  ;;  %vm126_vm0 = vcmp.lt.f32.partialorder %v300_v20, 0.5 }
  0x3c   :  { %v71_v25 = vmul.f32 0.071428575, %v302_v22  ;;  %vm127_vm1 = vcmp.lt.f32.partialorder %v302_v22, 0.5 }
  0x3d   :  { %166 = vlog2.f32 %v70_v24 }
  0x3e   :  { %168 = vlog2.f32 %v71_v25 }
  0x3f   :  { %170 = vrcp.f32 %v96_v26 }
  0x40   :  { %172 = vrcp.f32 %v97_v27 }
  0x41   :  { %174 = vlog2.f32 %v96_v26 }
  0x42   :  { %176 = vlog2.f32 %v97_v27 }
  0x47   :  { %v167_v28 = vpop.eup %166 }
  0x48   :  { %v169_v29 = vpop.eup %168  ;;  %v73_v30 = vmul.f32 0.6931472, %v167_v28 }
  0x49   :  { %v75_v31 = vmul.f32 0.6931472, %v169_v29  ;;  %v171_v33 = vpop.eup %170 }
  0x4a   :  { %v76_v32 = vmul.f32 %v73_v30, %v68_v4  ;;  %v173_v35 = vpop.eup %172  ;;  %v100_v38 = vmul.f32 %v171_v33, %v96_v26 }
  0x4b   :  { %v77_v34 = vmul.f32 %v75_v31, %v69_v7  ;;  %v101_v39 = vmul.f32 %v173_v35, %v97_v27  ;;  %v175_v44 = vpop.eup %174 }
  0x4c   :  { %v78_v36 = vmul.f32 1.442695, %v76_v32  ;;  %v102_v40 = vsub.f32 2.0, %v100_v38  ;;  %v177_v47 = vpop.eup %176  ;;  %v115_v54 = vmul.f32 0.6931472, %v175_v44 }
  0x4d   :  { %v80_v37 = vmul.f32 1.442695, %v77_v34  ;;  %v103_v42 = vsub.f32 2.0, %v101_v39  ;;  %v117_v57 = vmul.f32 0.6931472, %v177_v47 }
  0x4e   :  { %178 = vpow2.f32 %v78_v36  ;;  %v104_v45 = vmul.f32 %v171_v33, %v102_v40  ;;  %v118_v59 = vmul.f32 14.0, %v115_v54 }
  0x4f   :  { %180 = vpow2.f32 %v80_v37  ;;  %v105_v48 = vmul.f32 %v173_v35, %v103_v42  ;;  %v119_v61 = vmul.f32 14.0, %v117_v57 }
  0x50   :  { %v110_v53 = vmul.f32 %v108_v46, %v104_v45 }
  0x51   :  { %v111_v56 = vmul.f32 %v109_v49, %v105_v48 }
  0x52   :  { %v112_v58 = vmul.f32 0.5, %v110_v53  ;;  %v122_v63 = vmul.f32 %v110_v53, %v300_v20 }
  0x53   :  { %v113_v60 = vmul.f32 0.5, %v111_v56  ;;  %v123_v1 = vmul.f32 %v111_v56, %v302_v22 }
  0x54   :  { %v120_v62 = vsub.f32 %v112_v58, %v118_v59 }
  0x55   :  { %v121_v0 = vsub.f32 %v113_v60, %v119_v61 }
  0x56   :  { %v124_v5 = vsub.f32 %v122_v63, %v120_v62 }
  0x57   :  { %v125_v7 = vsub.f32 %v123_v1, %v121_v0 }
  0x58   :  { %v179_v50 = vpop.eup %178 }
  0x59   :  { %v181_v51 = vpop.eup %180  ;;  %v82_v52 = vadd.f32 1.0, %v179_v50 }
  0x5a   :  { %v83_v55 = vadd.f32 1.0, %v181_v51 }
  0x5b   :  { %182 = vlog2.f32 %v82_v52 }
  0x5c   :  { %184 = vlog2.f32 %v83_v55 }
  0x65   :  { %v183_v2 = vpop.eup %182 }
  0x66   :  { %v185_v3 = vpop.eup %184  ;;  %v85_v4 = vmul.f32 0.6931472, %v183_v2 }
  0x67   :  { %v87_v6 = vmul.f32 0.6931472, %v185_v3 }
  0x68   :  { %v88_v8 = vmul.f32 14.0, %v85_v4 }
  0x69   :  { %v89_v9 = vmul.f32 14.0, %v87_v6 }
  0x6a   :  { %v128_v10 = vsel %vm126_vm0, %v88_v8, %v124_v5 }
  0x6b   :  { %v129_v11 = vsel %vm127_vm1, %v89_v9, %v125_v7  ;;  %136 = vst [vmem:[#allocation7] sm:$0xff] %v128_v10 }
  0x6c   :  { %137 = vst [vmem:[#allocation7 + $0x8] sm:$0xff] %v129_v11 }
  0x6d   :  { %241 = shalt.err (!%p238_p6)
}
  0x6e   :  { %s242_s8 = scalar_lea.hbm %s324_s2, 256 }
  0x6f   :  { %p243_p7 = scmp.ne.s32.totalorder %s324_s2, %s242_s8  ;;  %p246_p8 = scmp.lt.u32.totalorder %s242_s8, %s324_s2 }
  0x71   :  { %p248_p9 = pnand %p246_p8, %p243_p7 }
  0x73   :  { %251 = shalt.err (!%p248_p9)
}
  0x74   :  { %147 = dma.vmem_to_hbm [thread:$0]  %s145_s4, 256, %s324_s2, [#allocation4]  }
  0x75   :  { %256 = dma.done.wait [#allocation4], 256  }
  0x76   :  { %257 = vsyncadd [#allocation4], 4294967040 }
  0x77   :  { %151 = vsyncpa [#allocation3], 1 }
  0x78   :  { %152 = vsyncpa [#allocation6], 1 }
  0x79   :  { %153 = vsyncpa [#allocation4], 1 }

</bundles_post_ra>
